<compile_context>
chip_gen: v7x
topology: tpu7x:2x2x1
jax: 0.10.0
libtpu: 0.0.40
codegen_flags: <defaults>
</compile_context>

<pallas_src>
import functools

import jax
import jax.numpy as jnp
from jax.experimental import pallas as pl
from jax.experimental.pallas import tpu as pltpu


_TARGET_BLOCK_BYTES = 2 * 1024 * 1024  # ~2 MiB x-block per grid step


def _channel_attention_kernel(x_ref, w1t_ref, w2t_ref, out_ref, *, hw_valid):
    x = x_ref[...]                                   # (Bt, C, HWp), native dtype
    bt, _, hw_pad = x.shape

    # ---- Global pools over the spatial (lane) axis -------------------------
    if hw_valid != hw_pad:
        # Spatial axis was zero-padded to a lane multiple: mask it for max.
        lane = jax.lax.broadcasted_iota(jnp.int32, x.shape, dimension=2)
        neg = jnp.asarray(jnp.finfo(x.dtype).min, dtype=x.dtype)
        x_for_max = jnp.where(lane < hw_valid, x, neg)
    else:
        x_for_max = x

    # Sum accumulates in f32 (zero padding does not perturb the sum); the
    # divisor is the true H*W.
    avg = jnp.sum(x, axis=-1, dtype=jnp.float32) * (1.0 / hw_valid)   # (Bt, C)
    mx = jnp.max(x_for_max, axis=-1).astype(jnp.float32)              # (Bt, C)

    # ---- Batched 1x1-conv MLP (one pair of matmuls for both pools, all Bt) -
    pooled = jnp.concatenate([avg, mx], axis=0)                       # (2*Bt, C)
    w1t = w1t_ref[...].astype(jnp.float32)                            # (C, hid)
    w2t = w2t_ref[...].astype(jnp.float32)                            # (hid, C)

    h = jnp.maximum(
        jnp.dot(pooled, w1t, preferred_element_type=jnp.float32), 0.0)  # (2*Bt, hid)
    z = jnp.dot(h, w2t, preferred_element_type=jnp.float32)             # (2*Bt, C)

    logits = z[:bt, :] + z[bt:, :]                                     # (Bt, C)
    att = 1.0 / (1.0 + jnp.exp(-logits))                               # exact sigmoid

    # ---- Scale: broadcast per-(b, c) gate over lanes, native-dtype store ---
    out_ref[...] = (x * att.astype(x.dtype)[:, :, None]).astype(out_ref.dtype)


@jax.jit
def channel_attention_forward(x, w1, w2):
    """x: (B, C, H, W), w1: (C//16, C), w2: (C, C//16). Returns (B, C, H, W)."""
    B, C, H, W = x.shape
    hid = w1.shape[0]
    HW = H * W
    itemsize = x.dtype.itemsize

    # Lane-dense spatial axis (multiple of 128) -> unmasked vector stores.
    HW_pad = ((HW + 127) // 128) * 128
    x2 = x.reshape(B, C, HW)
    if HW_pad != HW:
        x2 = jnp.pad(x2, ((0, 0), (0, 0), (0, HW_pad - HW)))

    # Batch-tile: ~2 MiB x blocks, but keep >= 2 grid steps (both TCs on v7x).
    per_image_bytes = C * HW_pad * itemsize
    bt = max(1, _TARGET_BLOCK_BYTES // per_image_bytes)
    if B > 1:
        bt = min(bt, -(-B // 2))
    bt = min(bt, B)
    num_steps = -(-B // bt)
    b_pad = num_steps * bt
    if b_pad != B:
        x2 = jnp.pad(x2, ((0, b_pad - B), (0, 0), (0, 0)))

    # Weights pre-transposed once in the wrapper so the in-kernel MLP is two
    # plain matmuls with no transposes.
    w1t = jnp.transpose(w1)   # (C, hid)
    w2t = jnp.transpose(w2)   # (hid, C)

    flops = b_pad * C * (3 * HW_pad + 8 * hid)
    bytes_accessed = (2 * b_pad * C * HW_pad * itemsize
                      + w1.size * w1.dtype.itemsize
                      + w2.size * w2.dtype.itemsize)
    cost = pl.CostEstimate(flops=flops, transcendentals=b_pad * C,
                           bytes_accessed=bytes_accessed)

    kernel = functools.partial(_channel_attention_kernel, hw_valid=HW)

    out = pl.pallas_call(
        kernel,
        out_shape=jax.ShapeDtypeStruct((b_pad, C, HW_pad), x.dtype),
        grid=(num_steps,),
        in_specs=[
            pl.BlockSpec((bt, C, HW_pad), lambda b: (b, 0, 0)),   # pipelined x slab
            pl.BlockSpec((C, hid), lambda b: (0, 0)),             # VMEM-resident W1^T
            pl.BlockSpec((hid, C), lambda b: (0, 0)),             # VMEM-resident W2^T
        ],
        out_specs=pl.BlockSpec((bt, C, HW_pad), lambda b: (b, 0, 0)),
        compiler_params=pltpu.CompilerParams(
            dimension_semantics=("parallel",)),
        cost_estimate=cost,
    )(x2, w1t, w2t)

    return out[:B, :, :HW].reshape(B, C, H, W)


def reference_forward(x, w1, w2):
    avg = jnp.mean(x, axis=(2, 3))                   # (B, C)
    mx = jnp.max(x, axis=(2, 3))                     # (B, C)

    def mlp(p):
        h = jnp.maximum(p @ w1.T, 0.0)
        return h @ w2.T

    att = jax.nn.sigmoid(mlp(avg) + mlp(mx))         # (B, C)
    return x * att[:, :, None, None]


if __name__ == "__main__":
    # in_planes=32 -> hidden = 32 // 16 = 2 (the module hardcodes //16).
    B, C, H, W = 2, 32, 16, 16
    hid = C // 16

    key = jax.random.PRNGKey(0)
    kx, k1, k2 = jax.random.split(key, 3)
    x = jax.random.normal(kx, (B, C, H, W), dtype=jnp.float32)

    # Deterministic kaiming-uniform-ish init for the two 1x1 conv weights.
    lim1 = 1.0 / (C ** 0.5)
    lim2 = 1.0 / (hid ** 0.5)
    w1 = jax.random.uniform(k1, (hid, C), minval=-lim1, maxval=lim1, dtype=jnp.float32)
    w2 = jax.random.uniform(k2, (C, hid), minval=-lim2, maxval=lim2, dtype=jnp.float32)

    out = channel_attention_forward(x, w1, w2)
    out = jax.block_until_ready(out)

    ref = reference_forward(x, w1, w2)
    assert out.shape == (B, C, H, W)
    assert jnp.allclose(out, ref, rtol=1e-2, atol=1e-2), "mismatch vs reference"

    print("KERNEL_OK")
</pallas_src>

<mosaic_0001>
module attributes {stable_mosaic.version = 11 : i64} {
  func.func @_channel_attention_kernel(%arg0: i32, %arg1: memref<1x32x256xf32, #tpu.memory_space<vmem>>, %arg2: memref<32x2xf32, #tpu.memory_space<vmem>>, %arg3: memref<2x32xf32, #tpu.memory_space<vmem>>, %arg4: memref<1x32x256xf32, #tpu.memory_space<vmem>>) attributes {dimension_semantics = [#tpu.dimension_semantics<parallel>], iteration_bounds = array<i64: 2>, scalar_prefetch = 0 : i64, scratch_operands = 0 : i64, tpu.core_type = #tpu.core_type<tc>, window_params = [{transform_indices = @transform_0, window_bounds = array<i64: 1, 32, 256>}, {pipeline_mode = #tpu.pipeline_mode<synchronous>, transform_indices = @transform_1, window_bounds = array<i64: 32, 2>}, {pipeline_mode = #tpu.pipeline_mode<synchronous>, transform_indices = @transform_2, window_bounds = array<i64: 2, 32>}, {transform_indices = @transform_3, window_bounds = array<i64: 1, 32, 256>}]} {
    %c0 = arith.constant 0 : index
    %c0_0 = arith.constant 0 : index
    %c0_1 = arith.constant 0 : index
    %0 = vector.load %arg1[%c0, %c0_0, %c0_1] : memref<1x32x256xf32, #tpu.memory_space<vmem>>, vector<1x32x256xf32>
    %cst = arith.constant dense<0.000000e+00> : vector<1x32xf32>
    %1 = vector.multi_reduction <add>, %0, %cst [2] : vector<1x32x256xf32> to vector<1x32xf32>
    %cst_2 = arith.constant 3.906250e-03 : f32
    %2 = vector.broadcast %cst_2 : f32 to vector<1x32xf32>
    %3 = arith.mulf %1, %2 : vector<1x32xf32>
    %cst_3 = arith.constant dense<0xFF800000> : vector<1x32xf32>
    %4 = vector.multi_reduction <maximumf>, %0, %cst_3 [2] : vector<1x32x256xf32> to vector<1x32xf32>
    %5 = tpu.concatenate %3, %4 in 0 : vector<1x32xf32>, vector<1x32xf32> -> vector<2x32xf32>
    %c0_4 = arith.constant 0 : index
    %c0_5 = arith.constant 0 : index
    %6 = vector.load %arg2[%c0_4, %c0_5] : memref<32x2xf32, #tpu.memory_space<vmem>>, vector<32x2xf32>
    %c0_6 = arith.constant 0 : index
    %c0_7 = arith.constant 0 : index
    %7 = vector.load %arg3[%c0_6, %c0_7] : memref<2x32xf32, #tpu.memory_space<vmem>>, vector<2x32xf32>
    %cst_8 = arith.constant dense<0.000000e+00> : vector<2x2xf32>
    %8 = tpu.matmul %5, %6, %cst_8 {dimension_numbers = #tpu.dot_dimension_numbers<[1], [0], [0], [1], [0, 0, 1, 1], [], []>} : vector<2x32xf32>, vector<32x2xf32>, vector<2x2xf32> -> vector<2x2xf32>
    %cst_9 = arith.constant 0.000000e+00 : f32
    %9 = vector.broadcast %cst_9 : f32 to vector<2x2xf32>
    %10 = arith.maximumf %8, %9 : vector<2x2xf32>
    %cst_10 = arith.constant dense<0.000000e+00> : vector<2x32xf32>
    %11 = tpu.matmul %10, %7, %cst_10 {dimension_numbers = #tpu.dot_dimension_numbers<[1], [0], [0], [1], [0, 0, 1, 1], [], []>} : vector<2x2xf32>, vector<2x32xf32>, vector<2x32xf32> -> vector<2x32xf32>
    %12 = vector.extract_strided_slice %11 {offsets = [0, 0], sizes = [1, 32], strides = [1, 1]} : vector<2x32xf32> to vector<1x32xf32>
    %13 = vector.extract_strided_slice %11 {offsets = [1, 0], sizes = [1, 32], strides = [1, 1]} : vector<2x32xf32> to vector<1x32xf32>
    %14 = arith.addf %12, %13 : vector<1x32xf32>
    %cst_11 = arith.constant 0.000000e+00 : f32
    %15 = vector.broadcast %cst_11 : f32 to vector<1x32xf32>
    %16 = arith.subf %15, %14 : vector<1x32xf32>
    %17 = math.exp %16 : vector<1x32xf32>
    %cst_12 = arith.constant 1.000000e+00 : f32
    %18 = vector.broadcast %cst_12 : f32 to vector<1x32xf32>
    %19 = arith.addf %18, %17 : vector<1x32xf32>
    %cst_13 = arith.constant 1.000000e+00 : f32
    %20 = vector.broadcast %cst_13 : f32 to vector<1x32xf32>
    %21 = arith.divf %20, %19 : vector<1x32xf32>
    %22 = vector.shape_cast %21 : vector<1x32xf32> to vector<1x32x1xf32>
    %23 = vector.broadcast %22 : vector<1x32x1xf32> to vector<1x32x256xf32>
    %24 = arith.mulf %0, %23 : vector<1x32x256xf32>
    %c0_14 = arith.constant 0 : index
    %c0_15 = arith.constant 0 : index
    %c0_16 = arith.constant 0 : index
    %25 = vector.load %arg4[%c0_14, %c0_15, %c0_16] : memref<1x32x256xf32, #tpu.memory_space<vmem>>, vector<1x32x256xf32>
    tpu.vector_store %arg4[%c0_14, %c0_15, %c0_16], %24 {strides = array<i32>} : memref<1x32x256xf32, #tpu.memory_space<vmem>>, vector<1x32x256xf32>,
    return
  }
  func.func @transform_0(%arg0: i32) -> (i32, i32, i32) {
    %c0_i32 = arith.constant 0 : i32
    %c0_i32_0 = arith.constant 0 : i32
    %c0_i32_1 = arith.constant 0 : i32
    return %arg0, %c0_i32, %c0_i32_0 : i32, i32, i32
  }
  func.func @transform_1(%arg0: i32) -> (i32, i32) {
    %c0_i32 = arith.constant 0 : i32
    %c0_i32_0 = arith.constant 0 : i32
    %c0_i32_1 = arith.constant 0 : i32
    return %c0_i32, %c0_i32_0 : i32, i32
  }
  func.func @transform_2(%arg0: i32) -> (i32, i32) {
    %c0_i32 = arith.constant 0 : i32
    %c0_i32_0 = arith.constant 0 : i32
    %c0_i32_1 = arith.constant 0 : i32
    return %c0_i32, %c0_i32_0 : i32, i32
  }
  func.func @transform_3(%arg0: i32) -> (i32, i32, i32) {
    %c0_i32 = arith.constant 0 : i32
    %c0_i32_0 = arith.constant 0 : i32
    %c0_i32_1 = arith.constant 0 : i32
    return %arg0, %c0_i32, %c0_i32_0 : i32, i32, i32
  }
}

</mosaic_0001>

<bundles_post_ra>
// kernel: channel_attention_forward.1
= control target key start
LH: loop header
LB: loop body
LE: loop exit
PB: predicated region body
PF: predicated region fallthrough
CT: control target
= control target key end

     0   :  { %s614_s12 = smov 0   ;;  %s695_s0 = inlined_call_operand.vmem [shape: f32[2,32,256], index: 0, kind: input, shape index: {}]   ;;  %s696_s1 = inlined_call_operand.vmem [shape: f32[32,2], index: 1, kind: input, shape index: {}]   ;;  %s697_s2 = inlined_call_operand.vmem [shape: f32[2,32], index: 2, kind: input, shape index: {}]   ;;  %s698_s3 = inlined_call_operand.vmem [shape: f32[2,32,256], index: 3, kind: output, shape index: {}]  }
   0x1 LB: > { %s523_s13 = sadd.s32 4294967295, %s589_s12   ;;  %p527_p0 = scmp.ge.s32.totalorder %s589_s12, 1  ;;  %s589_s12 = sphi %s614_s12, %s13_s12  }
   0x2   : > { %p137_p1 = scmp.lt.s32.totalorder %s589_s12, 3 }
   0x4   : > { %p138_p2 = pnand %p527_p0, %p137_p1 }
   0x5   : > { %p161_p3 = scmp.lt.s32.totalorder (!%p138_p2), %s523_s13, 1  ;;  %v265_v16 = vld [vmem:[%s696_s1] sm:$0xff] (!%p138_p2)  ;;  %v266_v17 = vld [vmem:[%s696_s1 + $0x8] sm:$0xff] (!%p138_p2)  ;;  %v591_v19 = vmov (!%p138_p2), 0.0|0.0   ;;  %v267_v20 = vld [vmem:[%s696_s1 + $0x10] sm:$0xff] (!%p138_p2)  ;;  %vm592_vm0 = vmmov (!%p138_p2), 0   ;;  %v211_v24 = vlaneseq (!%p138_p2) }
   0x6   : > { %141 = sbr.rel (%p138_p2) target bundleno = 765 (0x2fd), region = 32  ;;  %v563_v18 = vpack.c.bf16 (!%p138_p2), %v266_v17, %v265_v16  ;;  %562 = vmatprep.subr.bf16.mxu0 (!%p138_p2), %v591_v19  ;;  %v268_v21 = vld [vmem:[%s696_s1 + $0x18] sm:$0xff] (!%p138_p2)  ;;  %v593_v23 = vmov (!%p138_p2), 0.0   ;;  %vm222_vm1 = vcmask (!%p138_p2), 130112   ;;  %vm229_vm2 = vcmask (!%p138_p2), 195712  }
   0x7   : > { %v566_v22 = vpack.c.bf16 (!%p138_p2), %v268_v21, %v267_v20  ;;  %554 = vmatprep.mubr.msk.f32.mxu0 (!%p138_p2), %vm592_vm0, %v593_v23  ;;  %557 = vmatprep.subr.mxu1 (!%p138_p2), %v593_v23  ;;  %v212_v25 = vand.u32 (!%p138_p2), 127, %v211_v24  ;;  %v214_v28 = vshrl.u32 (!%p138_p2), %v211_v24, 7  ;;  %vm236_vm3 = vcmask (!%p138_p2), 261312   ;;  %v269_v61 = vld [vmem:[%s697_s2] sm:$0x3] (!%p138_p2) }
   0x8   : > { %564 = vmatpush3.bf16.msra.mxu0 (!%p138_p2), %v563_v18  ;;  %559 = vmatprep.mubr.msk.f32.mxu1 (!%p138_p2), %vm592_vm0, %v593_v23  ;;  %vm263_vm4 = vcmask (!%p138_p2), 1040384   ;;  %vm270_vm5 = vcmask (!%p138_p2), 261120   ;;  %vm349_vm6 = vcmask (!%p138_p2), 1041408   ;;  %vm345_vm7 = vcmask (!%p138_p2), 15360  }
   0x9   : > { %565 = vmatprep.subr.bf16.mxu0 (!%p138_p2), %v591_v19  ;;  %v217_v27 = vadd.s32 (!%p138_p2), 4294967288, %v212_v25  ;;  %v224_v30 = vadd.s32 (!%p138_p2), 4294967280, %v212_v25  ;;  %v215_v33 = vsub.s32 (!%p138_p2), %v212_v25, %v214_v28  ;;  %v231_v35 = vadd.s32 (!%p138_p2), 4294967272, %v212_v25  ;;  %558 = vmatpush3.msk.msra.mxu1 (!%p138_p2), %vm349_vm6, %v269_v61 }
   0xa   : > { %v435_v17 = vsub.s32 (!%p138_p2), 0, %v214_v28 }
   0xb   : > { %v220_v32 = vsub.s32 (!%p138_p2), %v217_v27, %v214_v28  ;;  %v227_v38 = vsub.s32 (!%p138_p2), %v224_v30, %v214_v28  ;;  %v234_v43 = vsub.s32 (!%p138_p2), %v231_v35, %v214_v28 }
   0xc   : > { %567 = vmatpush3.bf16.msra.mxu0 (!%p138_p2), %v566_v22 }
   0xd   : > { %s700_s13 = smov (!%p161_p3, %s523_s13), 1 }
   0xe   : > { %s537_s14 = sshll.u32 %s700_s13, 6 }
   0xf   : > { %s165_s17 = scalar_lea.vmem %s695_s0, %s537_s14  ;;  %s170_s30 = scalar_lea.vmem %s698_s3, %s537_s14 }
  0x10   : > { %v630_v0 = vld [vmem:[%s165_s17 + $0x20] sm:$0xff]  ;;  %v632_v1 = vld [vmem:[%s165_s17 + $0x28] sm:$0xff]  ;;  %v640_v5 = vld [vmem:[%s165_s17 + $0x30] sm:$0xff] }
  0x11   : > { %v634_v2 = vld [vmem:[%s165_s17] sm:$0xff]  ;;  %v185_v3 = vadd.f32 %v632_v1, %v630_v0  ;;  %v638_v4 = vld [vmem:[%s165_s17 + $0x8] sm:$0xff]  ;;  %v642_v6 = vld [vmem:[%s165_s17 + $0x38] sm:$0xff]  ;;  %v201_v15 = vmax.f32 %v630_v0, %v632_v1 }
  0x12   : > { %v179_v7 = vadd.f32 %v638_v4, %v634_v2  ;;  %v646_v8 = vld [vmem:[%s165_s17 + $0x10] sm:$0xff]  ;;  %v648_v9 = vld [vmem:[%s165_s17 + $0x18] sm:$0xff]  ;;  %v188_v10 = vadd.f32 %v642_v6, %v640_v5  ;;  %v195_v13 = vmax.f32 %v634_v2, %v638_v4  ;;  %v204_v14 = vmax.f32 %v640_v5, %v642_v6 }
  0x13   : > { %186 = vadd.xlane.f32.xlu1 %v185_v3  ;;  %v182_v11 = vadd.f32 %v648_v9, %v646_v8  ;;  %v198_v12 = vmax.f32 %v646_v8, %v648_v9 }
  0x14   : > { %180 = vadd.xlane.f32.xlu0 %v179_v7 }
  0x17   : > { %189 = vadd.xlane.f32.xlu1 %v188_v10 }
  0x18   : > { %183 = vadd.xlane.f32.xlu0 %v182_v11 }
  0x1b   : > { %199 = vmax.xlane.f32.xlu1 %v198_v12 }
  0x1c   : > { %196 = vmax.xlane.f32.xlu0 %v195_v13 }
  0x1f   : > { %205 = vmax.xlane.f32.xlu1 %v204_v14 }
  0x20   : > { %202 = vmax.xlane.f32.xlu0 %v201_v15 }
  0xa0   : > { %v187_v26 = vpop.xlane.xlu1 %186 }
  0xa1   : > { %v181_v29 = vpop.xlane.xlu0 %180  ;;  %v193_v39 = vmul.f32 0.00390625, %v187_v26 }
  0xa2   : > { %v191_v34 = vmul.f32 0.00390625, %v181_v29 }
  0xa3   : > { %v228_v49 = vrot.slane %v193_v39, %v227_v38 }
  0xa4   : > { %v190_v31 = vpop.xlane.xlu1 %189  ;;  %v216_v42 = vrot.slane %v191_v34, %v215_v33 }
  0xa5   : > { %v184_v36 = vpop.xlane.xlu0 %183  ;;  %v194_v44 = vmul.f32 0.00390625, %v190_v31 }
  0xa6   : > { %v192_v37 = vmul.f32 0.00390625, %v184_v36 }
  0xa7   : > { %v235_v51 = vrot.slane %v194_v44, %v234_v43 }
  0xa8   : > { %v221_v40 = vrot.slane %v192_v37, %v220_v32  ;;  %v200_v41 = vpop.xlane.xlu1 %199 }
  0xa9   : > { %v197_v45 = vpop.xlane.xlu0 %196  ;;  %v250_v47 = vrot.slane %v200_v41, %v220_v32 }
  0xaa   : > { %v223_v46 = vsel %vm222_vm1, %v221_v40, %v216_v42  ;;  %v246_v48 = vrot.slane %v197_v45, %v215_v33 }
  0xab   : > { %v230_v55 = vsel %vm229_vm2, %v228_v49, %v223_v46 }
  0xac   : > { %v206_v50 = vpop.xlane.xlu1 %205  ;;  %v251_v56 = vsel %vm222_vm1, %v250_v47, %v246_v48  ;;  %v237_v59 = vsel %vm236_vm3, %v235_v51, %v230_v55 }
  0xad   : > { %v203_v52 = vpop.xlane.xlu0 %202  ;;  %v260_v53 = vrot.slane %v206_v50, %v234_v43 }
  0xae   : > { %v255_v54 = vrot.slane %v203_v52, %v227_v38 }
  0xb0   : > { %v256_v57 = vsel %vm229_vm2, %v255_v54, %v251_v56 }
  0xb1   : > { %v261_v58 = vsel %vm236_vm3, %v260_v53, %v256_v57 }
  0xb2   : > { %v264_v60 = vsel %vm263_vm4, %v237_v59, %v261_v58 }
  0xb3   : > { %555 = vmatmul.mubr.msk.f32.vlgmr.msra.gmra.mrb[0].mxu0 %vm270_vm5, %v264_v60 }
 0x186   : > { %v340_v62 = vpop.f32.mrb[0].mxu0 }
 0x187   : > { %v344_v63 = vmax.f32 %v340_v62, 0.0  ;;  %v556_v3 = vpop.f32.mrb[1].mxu0 }
 0x189   : > { %560 = vmatmul.mubr.msk.f32.vlgmr.msra.gmra.mrb[0].mxu1 %vm345_vm7, %v344_v63 }
 0x25c   : > { %v419_v7 = vpop.f32.mrb[0].mxu1 }
 0x25d   : > { %v424_v10 = vrot.slane %v419_v7, 1  ;;  %v561_v11 = vpop.f32.mrb[1].mxu1 }
 0x25f   : > { %v426_v12 = vadd.f32 %v424_v10, %v419_v7 }
 0x261   : > { %v427_v13 = vsub.f32 0.0, %v426_v12 }
 0x263   : > { %v428_v14 = vmul.f32 1.442695, %v427_v13 }
 0x265   : > { %579 = vpow2.f32 %v428_v14 }
 0x26f   : > { %v580_v15 = vpop.eup %579 }
 0x270   : > { %v430_v16 = vadd.f32 1.0, %v580_v15 }
 0x272   : > { %581 = vrcp.f32 %v430_v16 }
 0x27c   : > { %v582_v18 = vpop.eup %581 }
 0x27d   : > { %v436_v19 = vrot.slane %v582_v18, %v435_v17 }
 0x27f   : > { %442 = vbcast.lane.b32.xlu1 %v436_v19, 264  ;;  %438 = vbcast.lane.b32.xlu0 %v436_v19, 256 }
 0x283   : > { %446 = vbcast.lane.b32.xlu1 %v436_v19, 272 }
 0x287   : > { %450 = vbcast.lane.b32.xlu1 %v436_v19, 280 }
 0x2f1   : > { %v443_v20 = vpop.permute.xlu1 %442  ;;  %v439_v21 = vpop.permute.xlu0 %438 }
 0x2f2   : > { %v454_v22 = vmul.f32 %v443_v20, %v646_v8  ;;  %v455_v23 = vmul.f32 %v443_v20, %v648_v9  ;;  %v452_v24 = vmul.f32 %v439_v21, %v634_v2  ;;  %v453_v25 = vmul.f32 %v439_v21, %v638_v4 }
 0x2f4   : > { %462 = vst [vmem:[%s170_s30 + $0x10] sm:$0xff] %v454_v22  ;;  %463 = vst [vmem:[%s170_s30 + $0x18] sm:$0xff] %v455_v23 }
 0x2f5   : > { %460 = vst [vmem:[%s170_s30] sm:$0xff] %v452_v24  ;;  %461 = vst [vmem:[%s170_s30 + $0x8] sm:$0xff] %v453_v25  ;;  %v447_v26 = vpop.permute.xlu1 %446 }
 0x2f6   : > { %v456_v27 = vmul.f32 %v447_v26, %v630_v0  ;;  %v457_v28 = vmul.f32 %v447_v26, %v632_v1 }
 0x2f8   : > { %464 = vst [vmem:[%s170_s30 + $0x20] sm:$0xff] %v456_v27  ;;  %465 = vst [vmem:[%s170_s30 + $0x28] sm:$0xff] %v457_v28 }
 0x2f9   : > { %v451_v29 = vpop.permute.xlu1 %450 }
 0x2fa   : > { %v458_v8 = vmul.f32 %v451_v29, %v640_v5  ;;  %v459_v9 = vmul.f32 %v451_v29, %v642_v6 }
 0x2fc   : > { %466 = vst [vmem:[%s170_s30 + $0x30] sm:$0xff] %v458_v8  ;;  %467 = vst [vmem:[%s170_s30 + $0x38] sm:$0xff] %v459_v9 }
 0x2fd PF: > { %s13_s12 = sadd.s32 1, %s589_s12  }
 0x2fe   : > { %p10_p4 = scmp.ge.s32.totalorder %s13_s12, 4  }
 0x300   :  { %12 = sbr.rel (!%p10_p4) target bundleno = 1 (0x1), region = 62 }

</bundles_post_ra>
